<compile_context>
chip_gen: v6e
topology: v6e:2x2x1
jax: 0.10.0
libtpu: 0.0.40
codegen_flags: <defaults>
</compile_context>

<pallas_src>
import numpy as np
import jax
import jax.numpy as jnp
from jax.experimental import pallas as pl
from jax.experimental.pallas import tpu as pltpu

OUT_LANES = 128  # lane-dense output tile width (lane0 = recon error, lane1 = KL)


def _round_up(v, m):
    return -(-v // m) * m


def _leaky_relu(x, slope=0.01):
    # nn.LeakyReLU default negative_slope = 0.01
    return jnp.where(x > 0, x, slope * x)


def make_vae_kernel(n_hidden, latent_dim, input_size, d_in_pad, p_dim):
    """Fused VAE forward kernel.

    Refs: x (tb, d_in_pad) f32, eps (tb, L) f32,
          w_slab (n_layers, P, P) bf16 zero-padded, b_slab (n_layers, 1, P) f32,
          out (tb, 128) f32  [lane0 = recon error, lane1 = KL].
    Slab layer order:
      enc hidden * n_hidden, enc_mean, enc_log_var, dec hidden * n_hidden, dec_mean.
    """
    L = latent_dim

    def kernel(x_ref, eps_ref, w_ref, b_ref, out_ref):
        x = x_ref[...]        # (tb, d_in_pad) f32 -- only the real input lanes
        eps = eps_ref[...]    # (tb, L) f32
        tb = x.shape[0]

        def linear(h, idx, k_rows=p_dim):
            w = w_ref[idx]                       # (P, P) bf16, zero-padded
            if k_rows != p_dim:
                w = w[:k_rows, :]                # 16-aligned bf16 sublane slice
            return jnp.dot(h.astype(jnp.bfloat16), w,
                           preferred_element_type=jnp.float32) + b_ref[idx]

        # ---------------- encoder ----------------
        h = x
        for li in range(n_hidden):
            h = _leaky_relu(linear(h, li, d_in_pad if li == 0 else p_dim))
        k_head = d_in_pad if n_hidden == 0 else p_dim

        # Separate heads -> full-width results whose padded lanes are exactly 0
        # (zero weight columns + zero bias): no lane slicing / masking below.
        mean_f = linear(h, n_hidden, k_head)          # (tb, P), lanes >= L are 0
        log_var_f = linear(h, n_hidden + 1, k_head)   # (tb, P), lanes >= L are 0
        std_f = jnp.exp(0.5 * log_var_f)              # lanes >= L are exactly 1

        # reparameterization at full lane width; eps padded once with zeros so
        # z's padded lanes are 0 (decoder weight rows [L:P) are zero anyway).
        eps_f = jnp.concatenate(
            [eps, jnp.zeros((tb, p_dim - L), jnp.float32)], axis=-1)
        z = mean_f + eps_f * std_f                    # (tb, P)

        # ---------------- decoder ----------------
        hd = z
        for li in range(n_hidden):
            hd = _leaky_relu(linear(hd, n_hidden + 2 + li))
        dec_mean = linear(hd, 2 * n_hidden + 2)       # (tb, P), lanes >= d_in are 0

        # per-row reconstruction MSE over the real input lanes
        diff = dec_mean[:, :d_in_pad] - x
        re = jnp.sum(diff * diff, axis=-1, keepdims=True) * (1.0 / input_size)

        # per-row KL: 0.5 * sum(std - 1 - log(std) + mean^2); log(std) == 0.5*log_var.
        # Padded lanes contribute exactly 0 (1 - 1 - 0 + 0), so no mask needed.
        kl = 0.5 * jnp.sum(std_f - 1.0 - 0.5 * log_var_f + mean_f * mean_f,
                           axis=-1, keepdims=True)

        lanes = jax.lax.broadcasted_iota(jnp.int32, out_ref.shape, 1)
        out_ref[...] = jnp.where(lanes == 0, re, jnp.where(lanes == 1, kl, 0.0))

    return kernel


def pack_params(params, p_dim):
    """Pack all Linear weights/biases into two zero-padded slabs (bf16 / f32)."""
    layers = (list(params["enc_hidden"])
              + [params["enc_mean"], params["enc_log_var"]]
              + list(params["dec_hidden"])
              + [params["dec_mean"]])
    n_layers = len(layers)
    w_slab = np.zeros((n_layers, p_dim, p_dim), np.float32)
    b_slab = np.zeros((n_layers, 1, p_dim), np.float32)
    for i, (w, b) in enumerate(layers):
        w = np.asarray(w, dtype=np.float32)
        b = np.asarray(b, dtype=np.float32).reshape(1, -1)
        w_slab[i, :w.shape[0], :w.shape[1]] = w
        b_slab[i, :, :b.shape[1]] = b
    return jnp.asarray(w_slab).astype(jnp.bfloat16), jnp.asarray(b_slab)


def vae_forward_pallas(x, eps, params, recon_error_weight, beta=1.0):
    """Returns (reconstr_error (B,), kl (B,), average_negative_elbo scalar)."""
    x = x.astype(jnp.float32)
    B, d_in = x.shape
    latent = int(eps.shape[1])
    n_hidden = len(params["enc_hidden"])
    hidden_sizes = [int(w.shape[1]) for w, _ in params["enc_hidden"]]

    # Feature width: multiple of 128 lanes (lane-dense VPU/MXU; free in VMEM).
    p_dim = _round_up(max([d_in, latent] + hidden_sizes), 128)
    # x keeps (nearly) its real width in HBM; 16-aligned for the bf16 row slice.
    d_in_pad = _round_up(d_in, 16)

    # Batch tile: large (amortize ~0.35us/step overhead), >= 2 grid steps when
    # the batch allows it (v7x megacore), floor of 16 rows (bf16 sublane tile).
    B16 = _round_up(max(B, 16), 16)
    tb = min(2048, _round_up(pl.cdiv(B16, 2), 16))
    b_pad = _round_up(B16, tb)

    x_p = jnp.zeros((b_pad, d_in_pad), jnp.float32).at[:B, :d_in].set(x)
    eps_p = jnp.zeros((b_pad, latent), jnp.float32).at[:B, :].set(
        eps.astype(jnp.float32))
    w_slab, b_slab = pack_params(params, p_dim)
    n_layers = int(w_slab.shape[0])

    # advisory cost estimate (real, unpadded dims)
    enc = [d_in] + hidden_sizes
    dec = [latent] + hidden_sizes
    mm_dims = (list(zip(enc[:-1], enc[1:])) + [(enc[-1], latent)] * 2
               + list(zip(dec[:-1], dec[1:])) + [(dec[-1], d_in)])
    flops = 2 * b_pad * sum(i * o for i, o in mm_dims)
    transcendentals = b_pad * latent
    bytes_accessed = ((x_p.size + eps_p.size + b_slab.size + b_pad * OUT_LANES) * 4
                      + w_slab.size * 2)

    kernel = make_vae_kernel(n_hidden, latent, d_in, d_in_pad, p_dim)

    out = pl.pallas_call(
        kernel,
        out_shape=jax.ShapeDtypeStruct((b_pad, OUT_LANES), jnp.float32),
        grid_spec=pltpu.PrefetchScalarGridSpec(
            num_scalar_prefetch=0,
            grid=(b_pad // tb,),
            in_specs=[
                pl.BlockSpec((tb, d_in_pad), lambda i: (i, 0)),
                pl.BlockSpec((tb, latent), lambda i: (i, 0)),
                pl.BlockSpec((n_layers, p_dim, p_dim), lambda i: (0, 0, 0)),
                pl.BlockSpec((n_layers, 1, p_dim), lambda i: (0, 0, 0)),
            ],
            out_specs=pl.BlockSpec((tb, OUT_LANES), lambda i: (i, 0)),
        ),
        compiler_params=pltpu.CompilerParams(
            dimension_semantics=("parallel",)),
        cost_estimate=pl.CostEstimate(flops=int(flops),
                                      transcendentals=int(transcendentals),
                                      bytes_accessed=int(bytes_accessed)),
    )(x_p, eps_p, w_slab, b_slab)

    re = out[:B, 0]
    kl = out[:B, 1]
    elbo = jnp.mean(recon_error_weight * re + beta * kl)
    return re, kl, elbo


def vae_forward_ref(x, eps, params, recon_error_weight, beta=1.0,
                    bf16_matmul=False):
    """Pure-JAX reference.  bf16_matmul=True mimics the kernel's bf16 MXU operands."""
    def mm(a, w):
        if bf16_matmul:
            a = a.astype(jnp.bfloat16)
            w = w.astype(jnp.bfloat16)
        return jnp.dot(a, w, preferred_element_type=jnp.float32)

    h = x.astype(jnp.float32)
    for w, b in params["enc_hidden"]:
        h = _leaky_relu(mm(h, w) + b)
    mean = mm(h, params["enc_mean"][0]) + params["enc_mean"][1]
    log_var = mm(h, params["enc_log_var"][0]) + params["enc_log_var"][1]
    std = jnp.sqrt(jnp.exp(log_var))
    z = mean + eps * std
    hd = z
    for w, b in params["dec_hidden"]:
        hd = _leaky_relu(mm(hd, w) + b)
    dec_mean = mm(hd, params["dec_mean"][0]) + params["dec_mean"][1]
    re = jnp.mean((dec_mean - x) ** 2, axis=1)
    kl = 0.5 * jnp.sum(std - 1.0 - jnp.log(std + 1e-8) + mean * mean, axis=1)
    elbo = jnp.mean(recon_error_weight * re + beta * kl)
    return re, kl, elbo


def _linear_params(key, in_dim, out_dim):
    # deterministic init matching torch.nn.Linear's U(-1/sqrt(in), 1/sqrt(in))
    k_w, k_b = jax.random.split(key)
    bound = 1.0 / np.sqrt(in_dim)
    w = jax.random.uniform(k_w, (in_dim, out_dim), jnp.float32, -bound, bound)
    b = jax.random.uniform(k_b, (1, out_dim), jnp.float32, -bound, bound)
    return w, b


if __name__ == "__main__":
    # Small shapes consistent with the module: 1-d feature vectors per sample.
    B = 8            # batch
    INPUT = 16       # input_size
    HIDDEN = [32, 32]
    LATENT = 8       # latent_dim
    RECON_W = 0.5
    BETA = 1.0

    root = jax.random.PRNGKey(0)
    keys = jax.random.split(root, 16)
    ki = iter(keys)

    enc_arch = [INPUT] + HIDDEN
    enc_hidden = [_linear_params(next(ki), i, o)
                  for i, o in zip(enc_arch[:-1], enc_arch[1:])]
    enc_mean = _linear_params(next(ki), enc_arch[-1], LATENT)
    enc_log_var = _linear_params(next(ki), enc_arch[-1], LATENT)

    dec_arch = [LATENT] + HIDDEN
    dec_hidden = [_linear_params(next(ki), i, o)
                  for i, o in zip(dec_arch[:-1], dec_arch[1:])]
    dec_mean = _linear_params(next(ki), dec_arch[-1], INPUT)

    params = dict(enc_hidden=enc_hidden, enc_mean=enc_mean,
                  enc_log_var=enc_log_var, dec_hidden=dec_hidden,
                  dec_mean=dec_mean)

    x = jax.random.normal(next(ki), (B, INPUT), jnp.float32)
    eps = jax.random.normal(next(ki), (B, LATENT), jnp.float32)

    re, kl, elbo = vae_forward_pallas(x, eps, params, RECON_W, BETA)
    jax.block_until_ready((re, kl, elbo))

    # Tight check vs a reference that mirrors the kernel's bf16 matmul operands.
    re_b, kl_b, elbo_b = vae_forward_ref(x, eps, params, RECON_W, BETA,
                                         bf16_matmul=True)
    np.testing.assert_allclose(np.asarray(re), np.asarray(re_b), rtol=1e-3, atol=1e-3)
    np.testing.assert_allclose(np.asarray(kl), np.asarray(kl_b), rtol=1e-3, atol=1e-3)
    np.testing.assert_allclose(np.asarray(elbo), np.asarray(elbo_b), rtol=1e-3, atol=1e-3)

    # Looser check vs the full-f32 module semantics (bf16 operand rounding budget).
    re_r, kl_r, elbo_r = vae_forward_ref(x, eps, params, RECON_W, BETA)
    np.testing.assert_allclose(np.asarray(re), np.asarray(re_r), rtol=5e-2, atol=5e-2)
    np.testing.assert_allclose(np.asarray(kl), np.asarray(kl_r), rtol=5e-2, atol=5e-2)
    np.testing.assert_allclose(np.asarray(elbo), np.asarray(elbo_r), rtol=5e-2, atol=5e-2)

    print("KERNEL_OK")
</pallas_src>

<mosaic_0001>
module attributes {stable_mosaic.version = 11 : i64} {
  func.func @kernel(%arg0: i32, %arg1: memref<16x16xf32, #tpu.memory_space<vmem>>, %arg2: memref<16x8xf32, #tpu.memory_space<vmem>>, %arg3: memref<7x128x128xbf16, #tpu.memory_space<vmem>>, %arg4: memref<7x1x128xf32, #tpu.memory_space<vmem>>, %arg5: memref<16x128xf32, #tpu.memory_space<vmem>>) attributes {dimension_semantics = [#tpu.dimension_semantics<parallel>], iteration_bounds = array<i64: 1>, scalar_prefetch = 0 : i64, scratch_operands = 0 : i64, tpu.core_type = #tpu.core_type<tc>, window_params = [{transform_indices = @transform_0, window_bounds = array<i64: 16, 16>}, {transform_indices = @transform_1, window_bounds = array<i64: 16, 8>}, {pipeline_mode = #tpu.pipeline_mode<synchronous>, transform_indices = @transform_2, window_bounds = array<i64: 7, 128, 128>}, {pipeline_mode = #tpu.pipeline_mode<synchronous>, transform_indices = @transform_3, window_bounds = array<i64: 7, 1, 128>}, {transform_indices = @transform_4, window_bounds = array<i64: 16, 128>}]} {
    %c0 = arith.constant 0 : index
    %c0_0 = arith.constant 0 : index
    %0 = vector.load %arg1[%c0, %c0_0] : memref<16x16xf32, #tpu.memory_space<vmem>>, vector<16x16xf32>
    %c0_1 = arith.constant 0 : index
    %c0_2 = arith.constant 0 : index
    %1 = vector.load %arg2[%c0_1, %c0_2] : memref<16x8xf32, #tpu.memory_space<vmem>>, vector<16x8xf32>
    %c0_3 = arith.constant 0 : index
    %c0_4 = arith.constant 0 : index
    %c0_5 = arith.constant 0 : index
    %2 = vector.load %arg3[%c0_3, %c0_4, %c0_5] : memref<7x128x128xbf16, #tpu.memory_space<vmem>>, vector<1x128x128xbf16>
    %3 = vector.shape_cast %2 : vector<1x128x128xbf16> to vector<128x128xbf16>
    %4 = vector.extract_strided_slice %3 {offsets = [0, 0], sizes = [16, 128], strides = [1, 1]} : vector<128x128xbf16> to vector<16x128xbf16>
    %5 = arith.truncf %0 : vector<16x16xf32> to vector<16x16xbf16>
    %cst = arith.constant dense<0.000000e+00> : vector<16x128xf32>
    %6 = tpu.matmul %5, %4, %cst {dimension_numbers = #tpu.dot_dimension_numbers<[1], [0], [0], [1], [0, 0, 1, 1], [], []>} : vector<16x16xbf16>, vector<16x128xbf16>, vector<16x128xf32> -> vector<16x128xf32>
    %c0_6 = arith.constant 0 : index
    %c0_7 = arith.constant 0 : index
    %c0_8 = arith.constant 0 : index
    %7 = vector.load %arg4[%c0_6, %c0_7, %c0_8] : memref<7x1x128xf32, #tpu.memory_space<vmem>>, vector<1x1x128xf32>
    %8 = vector.shape_cast %7 : vector<1x1x128xf32> to vector<1x128xf32>
    %9 = vector.broadcast %8 : vector<1x128xf32> to vector<16x128xf32>
    %10 = arith.addf %6, %9 : vector<16x128xf32>
    %cst_9 = arith.constant 0.000000e+00 : f32
    %11 = vector.broadcast %cst_9 : f32 to vector<16x128xf32>
    %12 = arith.cmpf ogt, %10, %11 : vector<16x128xf32>
    %cst_10 = arith.constant 0.00999999977 : f32
    %13 = vector.broadcast %cst_10 : f32 to vector<16x128xf32>
    %14 = arith.mulf %13, %10 : vector<16x128xf32>
    %15 = arith.select %12, %10, %14 : vector<16x128xi1>, vector<16x128xf32>
    %c1 = arith.constant 1 : index
    %c0_11 = arith.constant 0 : index
    %c0_12 = arith.constant 0 : index
    %16 = vector.load %arg3[%c1, %c0_11, %c0_12] : memref<7x128x128xbf16, #tpu.memory_space<vmem>>, vector<1x128x128xbf16>
    %17 = vector.shape_cast %16 : vector<1x128x128xbf16> to vector<128x128xbf16>
    %18 = arith.truncf %15 : vector<16x128xf32> to vector<16x128xbf16>
    %cst_13 = arith.constant dense<0.000000e+00> : vector<16x128xf32>
    %19 = tpu.matmul %18, %17, %cst_13 {dimension_numbers = #tpu.dot_dimension_numbers<[1], [0], [0], [1], [0, 0, 1, 1], [], []>} : vector<16x128xbf16>, vector<128x128xbf16>, vector<16x128xf32> -> vector<16x128xf32>
    %c1_14 = arith.constant 1 : index
    %c0_15 = arith.constant 0 : index
    %c0_16 = arith.constant 0 : index
    %20 = vector.load %arg4[%c1_14, %c0_15, %c0_16] : memref<7x1x128xf32, #tpu.memory_space<vmem>>, vector<1x1x128xf32>
    %21 = vector.shape_cast %20 : vector<1x1x128xf32> to vector<1x128xf32>
    %22 = vector.broadcast %21 : vector<1x128xf32> to vector<16x128xf32>
    %23 = arith.addf %19, %22 : vector<16x128xf32>
    %cst_17 = arith.constant 0.000000e+00 : f32
    %24 = vector.broadcast %cst_17 : f32 to vector<16x128xf32>
    %25 = arith.cmpf ogt, %23, %24 : vector<16x128xf32>
    %cst_18 = arith.constant 0.00999999977 : f32
    %26 = vector.broadcast %cst_18 : f32 to vector<16x128xf32>
    %27 = arith.mulf %26, %23 : vector<16x128xf32>
    %28 = arith.select %25, %23, %27 : vector<16x128xi1>, vector<16x128xf32>
    %c2 = arith.constant 2 : index
    %c0_19 = arith.constant 0 : index
    %c0_20 = arith.constant 0 : index
    %29 = vector.load %arg3[%c2, %c0_19, %c0_20] : memref<7x128x128xbf16, #tpu.memory_space<vmem>>, vector<1x128x128xbf16>
    %30 = vector.shape_cast %29 : vector<1x128x128xbf16> to vector<128x128xbf16>
    %31 = arith.truncf %28 : vector<16x128xf32> to vector<16x128xbf16>
    %cst_21 = arith.constant dense<0.000000e+00> : vector<16x128xf32>
    %32 = tpu.matmul %31, %30, %cst_21 {dimension_numbers = #tpu.dot_dimension_numbers<[1], [0], [0], [1], [0, 0, 1, 1], [], []>} : vector<16x128xbf16>, vector<128x128xbf16>, vector<16x128xf32> -> vector<16x128xf32>
    %c2_22 = arith.constant 2 : index
    %c0_23 = arith.constant 0 : index
    %c0_24 = arith.constant 0 : index
    %33 = vector.load %arg4[%c2_22, %c0_23, %c0_24] : memref<7x1x128xf32, #tpu.memory_space<vmem>>, vector<1x1x128xf32>
    %34 = vector.shape_cast %33 : vector<1x1x128xf32> to vector<1x128xf32>
    %35 = vector.broadcast %34 : vector<1x128xf32> to vector<16x128xf32>
    %36 = arith.addf %32, %35 : vector<16x128xf32>
    %c3 = arith.constant 3 : index
    %c0_25 = arith.constant 0 : index
    %c0_26 = arith.constant 0 : index
    %37 = vector.load %arg3[%c3, %c0_25, %c0_26] : memref<7x128x128xbf16, #tpu.memory_space<vmem>>, vector<1x128x128xbf16>
    %38 = vector.shape_cast %37 : vector<1x128x128xbf16> to vector<128x128xbf16>
    %39 = arith.truncf %28 : vector<16x128xf32> to vector<16x128xbf16>
    %cst_27 = arith.constant dense<0.000000e+00> : vector<16x128xf32>
    %40 = tpu.matmul %39, %38, %cst_27 {dimension_numbers = #tpu.dot_dimension_numbers<[1], [0], [0], [1], [0, 0, 1, 1], [], []>} : vector<16x128xbf16>, vector<128x128xbf16>, vector<16x128xf32> -> vector<16x128xf32>
    %c3_28 = arith.constant 3 : index
    %c0_29 = arith.constant 0 : index
    %c0_30 = arith.constant 0 : index
    %41 = vector.load %arg4[%c3_28, %c0_29, %c0_30] : memref<7x1x128xf32, #tpu.memory_space<vmem>>, vector<1x1x128xf32>
    %42 = vector.shape_cast %41 : vector<1x1x128xf32> to vector<1x128xf32>
    %43 = vector.broadcast %42 : vector<1x128xf32> to vector<16x128xf32>
    %44 = arith.addf %40, %43 : vector<16x128xf32>
    %cst_31 = arith.constant 5.000000e-01 : f32
    %45 = vector.broadcast %cst_31 : f32 to vector<16x128xf32>
    %46 = arith.mulf %45, %44 : vector<16x128xf32>
    %47 = math.exp %46 : vector<16x128xf32>
    %cst_32 = arith.constant 0.000000e+00 : f32
    %48 = vector.broadcast %cst_32 : f32 to vector<16x120xf32>
    %49 = tpu.concatenate %1, %48 in 1 : vector<16x8xf32>, vector<16x120xf32> -> vector<16x128xf32>
    %50 = arith.mulf %49, %47 : vector<16x128xf32>
    %51 = arith.addf %36, %50 : vector<16x128xf32>
    %c4 = arith.constant 4 : index
    %c0_33 = arith.constant 0 : index
    %c0_34 = arith.constant 0 : index
    %52 = vector.load %arg3[%c4, %c0_33, %c0_34] : memref<7x128x128xbf16, #tpu.memory_space<vmem>>, vector<1x128x128xbf16>
    %53 = vector.shape_cast %52 : vector<1x128x128xbf16> to vector<128x128xbf16>
    %54 = arith.truncf %51 : vector<16x128xf32> to vector<16x128xbf16>
    %cst_35 = arith.constant dense<0.000000e+00> : vector<16x128xf32>
    %55 = tpu.matmul %54, %53, %cst_35 {dimension_numbers = #tpu.dot_dimension_numbers<[1], [0], [0], [1], [0, 0, 1, 1], [], []>} : vector<16x128xbf16>, vector<128x128xbf16>, vector<16x128xf32> -> vector<16x128xf32>
    %c4_36 = arith.constant 4 : index
    %c0_37 = arith.constant 0 : index
    %c0_38 = arith.constant 0 : index
    %56 = vector.load %arg4[%c4_36, %c0_37, %c0_38] : memref<7x1x128xf32, #tpu.memory_space<vmem>>, vector<1x1x128xf32>
    %57 = vector.shape_cast %56 : vector<1x1x128xf32> to vector<1x128xf32>
    %58 = vector.broadcast %57 : vector<1x128xf32> to vector<16x128xf32>
    %59 = arith.addf %55, %58 : vector<16x128xf32>
    %cst_39 = arith.constant 0.000000e+00 : f32
    %60 = vector.broadcast %cst_39 : f32 to vector<16x128xf32>
    %61 = arith.cmpf ogt, %59, %60 : vector<16x128xf32>
    %cst_40 = arith.constant 0.00999999977 : f32
    %62 = vector.broadcast %cst_40 : f32 to vector<16x128xf32>
    %63 = arith.mulf %62, %59 : vector<16x128xf32>
    %64 = arith.select %61, %59, %63 : vector<16x128xi1>, vector<16x128xf32>
    %c5 = arith.constant 5 : index
    %c0_41 = arith.constant 0 : index
    %c0_42 = arith.constant 0 : index
    %65 = vector.load %arg3[%c5, %c0_41, %c0_42] : memref<7x128x128xbf16, #tpu.memory_space<vmem>>, vector<1x128x128xbf16>
    %66 = vector.shape_cast %65 : vector<1x128x128xbf16> to vector<128x128xbf16>
    %67 = arith.truncf %64 : vector<16x128xf32> to vector<16x128xbf16>
    %cst_43 = arith.constant dense<0.000000e+00> : vector<16x128xf32>
    %68 = tpu.matmul %67, %66, %cst_43 {dimension_numbers = #tpu.dot_dimension_numbers<[1], [0], [0], [1], [0, 0, 1, 1], [], []>} : vector<16x128xbf16>, vector<128x128xbf16>, vector<16x128xf32> -> vector<16x128xf32>
    %c5_44 = arith.constant 5 : index
    %c0_45 = arith.constant 0 : index
    %c0_46 = arith.constant 0 : index
    %69 = vector.load %arg4[%c5_44, %c0_45, %c0_46] : memref<7x1x128xf32, #tpu.memory_space<vmem>>, vector<1x1x128xf32>
    %70 = vector.shape_cast %69 : vector<1x1x128xf32> to vector<1x128xf32>
    %71 = vector.broadcast %70 : vector<1x128xf32> to vector<16x128xf32>
    %72 = arith.addf %68, %71 : vector<16x128xf32>
    %cst_47 = arith.constant 0.000000e+00 : f32
    %73 = vector.broadcast %cst_47 : f32 to vector<16x128xf32>
    %74 = arith.cmpf ogt, %72, %73 : vector<16x128xf32>
    %cst_48 = arith.constant 0.00999999977 : f32
    %75 = vector.broadcast %cst_48 : f32 to vector<16x128xf32>
    %76 = arith.mulf %75, %72 : vector<16x128xf32>
    %77 = arith.select %74, %72, %76 : vector<16x128xi1>, vector<16x128xf32>
    %c6 = arith.constant 6 : index
    %c0_49 = arith.constant 0 : index
    %c0_50 = arith.constant 0 : index
    %78 = vector.load %arg3[%c6, %c0_49, %c0_50] : memref<7x128x128xbf16, #tpu.memory_space<vmem>>, vector<1x128x128xbf16>
    %79 = vector.shape_cast %78 : vector<1x128x128xbf16> to vector<128x128xbf16>
    %80 = arith.truncf %77 : vector<16x128xf32> to vector<16x128xbf16>
    %cst_51 = arith.constant dense<0.000000e+00> : vector<16x128xf32>
    %81 = tpu.matmul %80, %79, %cst_51 {dimension_numbers = #tpu.dot_dimension_numbers<[1], [0], [0], [1], [0, 0, 1, 1], [], []>} : vector<16x128xbf16>, vector<128x128xbf16>, vector<16x128xf32> -> vector<16x128xf32>
    %c6_52 = arith.constant 6 : index
    %c0_53 = arith.constant 0 : index
    %c0_54 = arith.constant 0 : index
    %82 = vector.load %arg4[%c6_52, %c0_53, %c0_54] : memref<7x1x128xf32, #tpu.memory_space<vmem>>, vector<1x1x128xf32>
    %83 = vector.shape_cast %82 : vector<1x1x128xf32> to vector<1x128xf32>
    %84 = vector.broadcast %83 : vector<1x128xf32> to vector<16x128xf32>
    %85 = arith.addf %81, %84 : vector<16x128xf32>
    %86 = vector.extract_strided_slice %85 {offsets = [0, 0], sizes = [16, 16], strides = [1, 1]} : vector<16x128xf32> to vector<16x16xf32>
    %87 = arith.subf %86, %0 : vector<16x16xf32>
    %88 = arith.mulf %87, %87 : vector<16x16xf32>
    %cst_55 = arith.constant dense<0.000000e+00> : vector<16xf32>
    %89 = vector.multi_reduction <add>, %88, %cst_55 [1] : vector<16x16xf32> to vector<16xf32>
    %90 = vector.shape_cast %89 : vector<16xf32> to vector<16x1xf32>
    %cst_56 = arith.constant 6.250000e-02 : f32
    %91 = vector.broadcast %cst_56 : f32 to vector<16x1xf32>
    %92 = arith.mulf %90, %91 : vector<16x1xf32>
    %cst_57 = arith.constant 1.000000e+00 : f32
    %93 = vector.broadcast %cst_57 : f32 to vector<16x128xf32>
    %94 = arith.subf %47, %93 : vector<16x128xf32>
    %cst_58 = arith.constant 5.000000e-01 : f32
    %95 = vector.broadcast %cst_58 : f32 to vector<16x128xf32>
    %96 = arith.mulf %95, %44 : vector<16x128xf32>
    %97 = arith.subf %94, %96 : vector<16x128xf32>
    %98 = arith.mulf %36, %36 : vector<16x128xf32>
    %99 = arith.addf %97, %98 : vector<16x128xf32>
    %cst_59 = arith.constant dense<0.000000e+00> : vector<16xf32>
    %100 = vector.multi_reduction <add>, %99, %cst_59 [1] : vector<16x128xf32> to vector<16xf32>
    %101 = vector.shape_cast %100 : vector<16xf32> to vector<16x1xf32>
    %cst_60 = arith.constant 5.000000e-01 : f32
    %102 = vector.broadcast %cst_60 : f32 to vector<16x1xf32>
    %103 = arith.mulf %102, %101 : vector<16x1xf32>
    %104 = tpu.iota {dimensions = array<i32: 1>} : vector<16x128xi32>
    %c0_i32 = arith.constant 0 : i32
    %105 = vector.broadcast %c0_i32 : i32 to vector<16x128xi32>
    %106 = arith.cmpi eq, %104, %105 : vector<16x128xi32>
    %c1_i32 = arith.constant 1 : i32
    %107 = vector.broadcast %c1_i32 : i32 to vector<16x128xi32>
    %108 = arith.cmpi eq, %104, %107 : vector<16x128xi32>
    %cst_61 = arith.constant 0.000000e+00 : f32
    %109 = vector.shape_cast %103 : vector<16x1xf32> to vector<16x1xf32>
    %110 = vector.broadcast %109 : vector<16x1xf32> to vector<16x128xf32>
    %111 = vector.broadcast %cst_61 : f32 to vector<16x128xf32>
    %112 = arith.select %108, %110, %111 : vector<16x128xi1>, vector<16x128xf32>
    %113 = vector.shape_cast %92 : vector<16x1xf32> to vector<16x1xf32>
    %114 = vector.broadcast %113 : vector<16x1xf32> to vector<16x128xf32>
    %115 = arith.select %106, %114, %112 : vector<16x128xi1>, vector<16x128xf32>
    %c0_62 = arith.constant 0 : index
    %c0_63 = arith.constant 0 : index
    %116 = vector.load %arg5[%c0_62, %c0_63] : memref<16x128xf32, #tpu.memory_space<vmem>>, vector<16x128xf32>
    tpu.vector_store %arg5[%c0_62, %c0_63], %115 {strides = array<i32>} : memref<16x128xf32, #tpu.memory_space<vmem>>, vector<16x128xf32>,
    return
  }
  func.func @transform_0(%arg0: i32) -> (i32, i32) {
    %c0_i32 = arith.constant 0 : i32
    %c0_i32_0 = arith.constant 0 : i32
    return %arg0, %c0_i32 : i32, i32
  }
  func.func @transform_1(%arg0: i32) -> (i32, i32) {
    %c0_i32 = arith.constant 0 : i32
    %c0_i32_0 = arith.constant 0 : i32
    return %arg0, %c0_i32 : i32, i32
  }
  func.func @transform_2(%arg0: i32) -> (i32, i32, i32) {
    %c0_i32 = arith.constant 0 : i32
    %c0_i32_0 = arith.constant 0 : i32
    %c0_i32_1 = arith.constant 0 : i32
    %c0_i32_2 = arith.constant 0 : i32
    return %c0_i32, %c0_i32_0, %c0_i32_1 : i32, i32, i32
  }
  func.func @transform_3(%arg0: i32) -> (i32, i32, i32) {
    %c0_i32 = arith.constant 0 : i32
    %c0_i32_0 = arith.constant 0 : i32
    %c0_i32_1 = arith.constant 0 : i32
    %c0_i32_2 = arith.constant 0 : i32
    return %c0_i32, %c0_i32_0, %c0_i32_1 : i32, i32, i32
  }
  func.func @transform_4(%arg0: i32) -> (i32, i32) {
    %c0_i32 = arith.constant 0 : i32
    %c0_i32_0 = arith.constant 0 : i32
    return %arg0, %c0_i32 : i32, i32
  }
}

</mosaic_0001>

<bundles_post_ra>
// kernel: tpu_custom_call.1
= control target key start
LH: loop header
LB: loop body
LE: loop exit
PB: predicated region body
PF: predicated region fallthrough
CT: control target
= control target key end

     0   :  { %9 = vsyncpa [#allocation3], 0  ;;  %s1375_s0 = inlined_call_operand.vmem [shape: f32[16,16], index: 0, kind: input, shape index: {}]   ;;  %s1376_s1 = inlined_call_operand.vmem [shape: f32[16,8], index: 1, kind: input, shape index: {}]   ;;  %s1377_s2 = inlined_call_operand.hbm [shape: bf16[7,128,128], index: 2, kind: input, shape index: {}]   ;;  %s1378_s3 = inlined_call_operand.vmem [shape: f32[7,1,128], index: 3, kind: input, shape index: {}]   ;;  %s1379_s4 = inlined_call_operand.hbm [shape: f32[16,128], index: 4, kind: output, shape index: {}]  }
   0x1   :  { %10 = vsyncpa [#allocation4], 0  ;;  %s1229_s15 = smov [#allocation2]  }
   0x2   :  { %s20_s16 = sshll.u32 %s1229_s15, 4  ;;  %s21_s16 = int_to_ptr.vmem [resolvable:$true] %s20_s16 }
   0x3   :  { %s1193_s17 = scalar_lea.vmem %s21_s16, 7168  ;;  %p1198_p1 = scmp.lt.s32.totalorder %s21_s16, %s21_s16 }
   0x4   :  { %p1194_p0 = scmp.ne.s32.totalorder %s21_s16, %s1193_s17  ;;  %p1199_p2 = scmp.lt.s32.totalorder %s1193_s17, %s1193_s17 }
   0x6   :  { %p1200_p3 = por %p1199_p2, %p1198_p1 }
   0x8   :  { %p1201_p4 = pnand %p1200_p3, %p1194_p0 }
   0xa   :  { %1204 = shalt.err (!%p1201_p4)
}
   0xb   :  { %s1230_s18 = smov 64   ;;  %s1231_s19 = smov 4  }
   0xc   :  { %26 = dma.hbm_to_vmem [thread:$0]  %s1377_s2, 7168, %s21_s16, [#allocation3], %s1230_s18, %s1230_s18, %s1231_s19  }
   0xd   :  { %1225 = dma.done.wait [#allocation3], 7168  }
   0xe   :  { %1226 = vsyncadd [#allocation3], 4294960128  ;;  %v1232_v0 = vmov 0.0   ;;  %vm1233_vm0 = vmmov 0   ;;  %v1132_v1 = vld [vmem:[#allocation2] sm:$0xff]   ;;  %v1279_v3 = vld [vmem:[%s1375_s0 + $0x8] sm:$0xff] }
   0xf   :  { %998 = vmatprep.subr.bf16.mxu0 %v1232_v0  ;;  %1000 = vmatprep.mubr.msk.bf16.mxu0 %vm1233_vm0, %v1232_v0  ;;  %v1274_v2 = vld [vmem:[%s1375_s0] sm:$0xff]  ;;  %vm53_vm1 = vcmask 130048   ;;  %v1133_v5 = vld [vmem:[#allocation2 + $0x78] sm:$0xff]   ;;  %v1134_v6 = vld [vmem:[#allocation2 + $0x70] sm:$0xff]   ;;  %vm460_vm6 = vcmask 64512  }
  0x10   :  { %1004 = vmatprep.subr.bf16.mxu1 %v1232_v0  ;;  %1020 = vmatprep.mubr.msk.bf16.mxu1 %vm1233_vm0, %v1232_v0  ;;  %v39_v4 = vpack.c.bf16 %v1279_v3, %v1274_v2  ;;  %v1135_v7 = vld [vmem:[#allocation2 + $0x68] sm:$0xff]   ;;  %v1136_v8 = vld [vmem:[#allocation2 + $0x60] sm:$0xff]   ;;  %v1137_v9 = vld [vmem:[#allocation2 + $0x58] sm:$0xff]  }
  0x11   :  { %999 = vmatpush3.bf16.msra.mxu0 %v1132_v1  ;;  %1005 = vmatpush3.bf16.msra.mxu1 %v1133_v5  ;;  %v1138_v10 = vld [vmem:[#allocation2 + $0x50] sm:$0xff]   ;;  %v1139_v11 = vld [vmem:[#allocation2 + $0x48] sm:$0xff]   ;;  %v1140_v12 = vld [vmem:[#allocation2 + $0x40] sm:$0xff]  }
  0x12   :  { %1024 = vmatprep.subr.bf16.mxu0 %v1232_v0  ;;  %1006 = vmatprep.subr.bf16.mxu1 %v1232_v0  ;;  %v1141_v13 = vld [vmem:[#allocation2 + $0xb8] sm:$0xff]   ;;  %v1143_v14 = vld [vmem:[#allocation2 + $0xb0] sm:$0xff]   ;;  %v1145_v15 = vld [vmem:[#allocation2 + $0xa8] sm:$0xff]  }
  0x13   :  { %v1147_v16 = vld [vmem:[#allocation2 + $0xa0] sm:$0xff]   ;;  %v1149_v17 = vld [vmem:[#allocation2 + $0x98] sm:$0xff]   ;;  %v1144_v31 = vld [vmem:[#allocation2 + $0xf0] sm:$0xff]  }
  0x14   :  { %1001 = vmatmul.mubr.msk.bf16.vlgmr.msra.gmra.mxu0 %vm53_vm1, %v39_v4  ;;  %v877_v18 = vld [vmem:[%s1378_s3] ss:$0 sm:$0xff]  ;;  %v1142_v29 = vld [vmem:[#allocation2 + $0xf8] sm:$0xff]   ;;  %v1146_v32 = vld [vmem:[#allocation2 + $0xe8] sm:$0xff]  }
  0x15   :  { %1040 = vmatprep.mubr.msk.bf16.mxu0 %vm1233_vm0, %v1232_v0  ;;  %1007 = vmatpush3.bf16.msra.mxu1 %v1134_v6  ;;  %v1148_v33 = vld [vmem:[#allocation2 + $0xe0] sm:$0xff]   ;;  %v1150_v34 = vld [vmem:[#allocation2 + $0xd8] sm:$0xff]   ;;  %v1151_v35 = vld [vmem:[#allocation2 + $0x90] sm:$0xff]  }
  0x16   :  { %1008 = vmatprep.subr.bf16.mxu1 %v1232_v0  ;;  %1025 = vmatpush3.bf16.msra.mxu0 %v1141_v13  ;;  %v1152_v36 = vld [vmem:[#allocation2 + $0xd0] sm:$0xff]   ;;  %v1153_v37 = vld [vmem:[#allocation2 + $0x88] sm:$0xff]   ;;  %v1155_v39 = vld [vmem:[#allocation2 + $0x80] sm:$0xff]  }
  0x17   :  { %1026 = vmatprep.subr.bf16.mxu0 %v1232_v0  ;;  %v1154_v38 = vld [vmem:[#allocation2 + $0xc8] sm:$0xff]   ;;  %v1156_v40 = vld [vmem:[#allocation2 + $0xc0] sm:$0xff]   ;;  %v1157_v53 = vld [vmem:[#allocation2 + $0x138] sm:$0xff]  }
  0x18   :  { %v881_v41 = vld [vmem:[%s1378_s3 + $0x1] ss:$0 sm:$0xff]  ;;  %v1158_v54 = vld [vmem:[#allocation2 + $0x130] sm:$0xff]   ;;  %v1159_v55 = vld [vmem:[#allocation2 + $0x128] sm:$0xff]  }
  0x19   :  { %1009 = vmatpush3.bf16.msra.mxu1 %v1135_v7  ;;  %v1160_v56 = vld [vmem:[#allocation2 + $0x120] sm:$0xff]   ;;  %v1161_v57 = vld [vmem:[#allocation2 + $0x118] sm:$0xff]   ;;  %v1162_v58 = vld [vmem:[#allocation2 + $0x110] sm:$0xff]  }
  0x1a   :  { %1010 = vmatprep.subr.bf16.mxu1 %v1232_v0  ;;  %1027 = vmatpush3.bf16.msra.mxu0 %v1143_v14  ;;  %v1163_v59 = vld [vmem:[#allocation2 + $0x108] sm:$0xff]   ;;  %v1164_v60 = vld [vmem:[#allocation2 + $0x100] sm:$0xff]  }
  0x1b   :  { %1028 = vmatprep.subr.bf16.mxu0 %v1232_v0  ;;  %v901_v61 = vld [vmem:[%s1378_s3 + $0x3] ss:$0 sm:$0xff] }
  0x1d   :  { %1011 = vmatpush3.bf16.msra.mxu1 %v1136_v8 }
  0x1e   :  { %1012 = vmatprep.subr.bf16.mxu1 %v1232_v0  ;;  %1029 = vmatpush3.bf16.msra.mxu0 %v1145_v15  ;;  %v891_v15 = vld [vmem:[%s1378_s3 + $0x2] ss:$0 sm:$0xff] }
  0x1f   :  { %1030 = vmatprep.subr.bf16.mxu0 %v1232_v0 }
  0x21   :  { %1013 = vmatpush3.bf16.msra.mxu1 %v1137_v9 }
  0x22   :  { %1014 = vmatprep.subr.bf16.mxu1 %v1232_v0  ;;  %1031 = vmatpush3.bf16.msra.mxu0 %v1147_v16  ;;  %v35_v16 = vld [vmem:[%s1376_s1] sm:$0xff] }
  0x23   :  { %1032 = vmatprep.subr.bf16.mxu0 %v1232_v0 }
  0x25   :  { %1015 = vmatpush3.bf16.msra.mxu1 %v1138_v10 }
  0x26   :  { %1016 = vmatprep.subr.bf16.mxu1 %v1232_v0  ;;  %1033 = vmatpush3.bf16.msra.mxu0 %v1149_v17 }
  0x27   :  { %1034 = vmatprep.subr.bf16.mxu0 %v1232_v0 }
  0x29   :  { %1017 = vmatpush3.bf16.msra.mxu1 %v1139_v11 }
  0x2a   :  { %1018 = vmatprep.subr.bf16.mxu1 %v1232_v0  ;;  %1035 = vmatpush3.bf16.msra.mxu0 %v1151_v35 }
  0x2b   :  { %1036 = vmatprep.subr.bf16.mxu0 %v1232_v0 }
  0x2d   :  { %1019 = vmatpush3.bf16.msra.mxu1 %v1140_v12 }
  0x2e   :  { %1044 = vmatprep.subr.bf16.mxu1 %v1232_v0  ;;  %1037 = vmatpush3.bf16.msra.mxu0 %v1153_v37  ;;  %v1165_v37 = vld [vmem:[#allocation2 + $0x178] sm:$0xff]  }
  0x2f   :  { %1038 = vmatprep.subr.bf16.mxu0 %v1232_v0 }
  0x32   :  { %1039 = vmatpush3.bf16.msra.mxu0 %v1155_v39  ;;  %v1167_v39 = vld [vmem:[#allocation2 + $0x168] sm:$0xff]  }
  0x33   :  { %1064 = vmatprep.subr.bf16.mxu0 %v1232_v0 }
  0xd4   :  { %v91_v19 = vpop.f32.mrf.mxu0 }
  0xd5   :  { %v92_v20 = vadd.f32 %v877_v18, %v91_v19 }
  0xd6   :  { %v1002_v21 = vpop.f32.mrf.mxu0 }
  0xd7   :  { %v100_v23 = vmul.f32 0.01, %v92_v20  ;;  %vm98_vm2 = vcmp.gt.f32.partialorder %v92_v20, 0.0 }
  0xd8   :  { %v94_v22 = vpop.f32.mrf.mxu0 }
  0xd9   :  { %v95_v24 = vadd.f32 %v877_v18, %v94_v22  ;;  %v102_v27 = vsel %vm98_vm2, %v92_v20, %v100_v23  ;;  %v36_v18 = vld [vmem:[%s1376_s1 + $0x8] sm:$0xff]  ;;  %v461_v20 = vsel %vm460_vm6, %v35_v16, 0.0 }
  0xda   :  { %v1003_v25 = vpop.f32.mrf.mxu0  ;;  %v462_v22 = vsel %vm460_vm6, %v36_v18, 0.0 }
  0xdb   :  { %vm99_vm3 = vcmp.gt.f32.partialorder %v95_v24, 0.0  ;;  %v101_v26 = vmul.f32 0.01, %v95_v24 }
  0xdd   :  { %v103_v28 = vsel %vm99_vm3, %v95_v24, %v101_v26 }
  0xde   :  { %v121_v30 = vpack.c.bf16 %v103_v28, %v102_v27 }
  0xe0   :  { %1021 = vmatmul.mubr.bf16.vlgmr.msra.gmra.mxu1 %v121_v30 }
  0xe1   :  { %1045 = vmatpush3.bf16.msra.mxu1 %v1142_v29  ;;  %1060 = vmatprep.mubr.msk.bf16.mxu1 %vm1233_vm0, %v1232_v0 }
  0xe2   :  { %1046 = vmatprep.subr.bf16.mxu1 %v1232_v0 }
  0xe5   :  { %1047 = vmatpush3.bf16.msra.mxu1 %v1144_v31 }
  0xe6   :  { %1048 = vmatprep.subr.bf16.mxu1 %v1232_v0 }
  0xe9   :  { %1049 = vmatpush3.bf16.msra.mxu1 %v1146_v32 }
  0xea   :  { %1050 = vmatprep.subr.bf16.mxu1 %v1232_v0 }
  0xed   :  { %1051 = vmatpush3.bf16.msra.mxu1 %v1148_v33 }
  0xee   :  { %1052 = vmatprep.subr.bf16.mxu1 %v1232_v0 }
  0xf1   :  { %1053 = vmatpush3.bf16.msra.mxu1 %v1150_v34 }
  0xf2   :  { %1054 = vmatprep.subr.bf16.mxu1 %v1232_v0 }
  0xf5   :  { %1055 = vmatpush3.bf16.msra.mxu1 %v1152_v36 }
  0xf6   :  { %1056 = vmatprep.subr.bf16.mxu1 %v1232_v0 }
  0xf9   :  { %1057 = vmatpush3.bf16.msra.mxu1 %v1154_v38  ;;  %v1166_v38 = vld [vmem:[#allocation2 + $0x170] sm:$0xff]  }
  0xfa   :  { %1058 = vmatprep.subr.bf16.mxu1 %v1232_v0 }
  0xfd   :  { %1059 = vmatpush3.bf16.msra.mxu1 %v1156_v40  ;;  %v1168_v40 = vld [vmem:[#allocation2 + $0x160] sm:$0xff]  }
  0xfe   :  { %1084 = vmatprep.subr.bf16.mxu1 %v1232_v0 }
 0x1a0   :  { %v212_v42 = vpop.f32.mrf.mxu1 }
 0x1a1   :  { %v213_v43 = vadd.f32 %v881_v41, %v212_v42  ;;  %v1170_v42 = vld [vmem:[#allocation2 + $0x150] sm:$0xff]  }
 0x1a2   :  { %v1022_v44 = vpop.f32.mrf.mxu1 }
 0x1a3   :  { %v221_v46 = vmul.f32 0.01, %v213_v43  ;;  %vm219_vm4 = vcmp.gt.f32.partialorder %v213_v43, 0.0  ;;  %v1172_v44 = vld [vmem:[#allocation2 + $0x140] sm:$0xff]  }
 0x1a4   :  { %v215_v45 = vpop.f32.mrf.mxu1 }
 0x1a5   :  { %v216_v47 = vadd.f32 %v881_v41, %v215_v45  ;;  %v223_v50 = vsel %vm219_vm4, %v213_v43, %v221_v46  ;;  %v1169_v41 = vld [vmem:[#allocation2 + $0x158] sm:$0xff]   ;;  %v1171_v43 = vld [vmem:[#allocation2 + $0x148] sm:$0xff]   ;;  %v1174_v46 = vld [vmem:[#allocation2 + $0x1b0] sm:$0xff]  }
 0x1a6   :  { %v1023_v48 = vpop.f32.mrf.mxu1  ;;  %v1173_v45 = vld [vmem:[#allocation2 + $0x1b8] sm:$0xff]  }
 0x1a7   :  { %vm220_vm5 = vcmp.gt.f32.partialorder %v216_v47, 0.0  ;;  %v222_v49 = vmul.f32 0.01, %v216_v47  ;;  %v1176_v48 = vld [vmem:[#allocation2 + $0x1a0] sm:$0xff]  }
 0x1a9   :  { %v224_v51 = vsel %vm220_vm5, %v216_v47, %v222_v49  ;;  %v1175_v47 = vld [vmem:[#allocation2 + $0x1a8] sm:$0xff]   ;;  %v1177_v49 = vld [vmem:[#allocation2 + $0x198] sm:$0xff]  }
 0x1aa   :  { %v242_v52 = vpack.c.bf16 %v224_v51, %v223_v50  ;;  %v911_v50 = vld [vmem:[%s1378_s3 + $0x4] ss:$0 sm:$0xff] }
 0x1ac   :  { %1041 = vmatmul.mubr.bf16.vlgmr.msra.gmra.mxu0 %v242_v52  ;;  %1061 = vmatmul.mubr.bf16.vlgmr.msra.gmra.mxu1 %v242_v52 }
 0x1ad   :  { %1080 = vmatprep.mubr.msk.bf16.mxu0 %vm1233_vm0, %v1232_v0  ;;  %1100 = vmatprep.mubr.msk.bf16.mxu1 %vm1233_vm0, %v1232_v0 }
 0x1ae   :  { %1065 = vmatpush3.bf16.msra.mxu0 %v1157_v53  ;;  %1085 = vmatpush3.bf16.msra.mxu1 %v1165_v37 }
 0x1af   :  { %1066 = vmatprep.subr.bf16.mxu0 %v1232_v0  ;;  %1086 = vmatprep.subr.bf16.mxu1 %v1232_v0 }
 0x1b2   :  { %1067 = vmatpush3.bf16.msra.mxu0 %v1158_v54  ;;  %1087 = vmatpush3.bf16.msra.mxu1 %v1166_v38 }
 0x1b3   :  { %1068 = vmatprep.subr.bf16.mxu0 %v1232_v0  ;;  %1088 = vmatprep.subr.bf16.mxu1 %v1232_v0 }
 0x1b6   :  { %1069 = vmatpush3.bf16.msra.mxu0 %v1159_v55  ;;  %1089 = vmatpush3.bf16.msra.mxu1 %v1167_v39 }
 0x1b7   :  { %1070 = vmatprep.subr.bf16.mxu0 %v1232_v0  ;;  %1090 = vmatprep.subr.bf16.mxu1 %v1232_v0 }
 0x1ba   :  { %1071 = vmatpush3.bf16.msra.mxu0 %v1160_v56  ;;  %1091 = vmatpush3.bf16.msra.mxu1 %v1168_v40 }
 0x1bb   :  { %1072 = vmatprep.subr.bf16.mxu0 %v1232_v0  ;;  %1092 = vmatprep.subr.bf16.mxu1 %v1232_v0 }
 0x1be   :  { %1073 = vmatpush3.bf16.msra.mxu0 %v1161_v57  ;;  %1093 = vmatpush3.bf16.msra.mxu1 %v1169_v41 }
 0x1bf   :  { %1074 = vmatprep.subr.bf16.mxu0 %v1232_v0  ;;  %1094 = vmatprep.subr.bf16.mxu1 %v1232_v0 }
 0x1c2   :  { %1075 = vmatpush3.bf16.msra.mxu0 %v1162_v58  ;;  %1095 = vmatpush3.bf16.msra.mxu1 %v1170_v42 }
 0x1c3   :  { %1076 = vmatprep.subr.bf16.mxu0 %v1232_v0  ;;  %1096 = vmatprep.subr.bf16.mxu1 %v1232_v0 }
 0x1c6   :  { %1077 = vmatpush3.bf16.msra.mxu0 %v1163_v59  ;;  %1097 = vmatpush3.bf16.msra.mxu1 %v1171_v43 }
 0x1c7   :  { %1078 = vmatprep.subr.bf16.mxu0 %v1232_v0  ;;  %1098 = vmatprep.subr.bf16.mxu1 %v1232_v0 }
 0x1ca   :  { %1079 = vmatpush3.bf16.msra.mxu0 %v1164_v60  ;;  %1099 = vmatpush3.bf16.msra.mxu1 %v1172_v44 }
 0x1cb   :  { %1104 = vmatprep.subr.bf16.mxu0 %v1232_v0 }
 0x26c   :  { %v333_v62 = vpop.f32.mrf.mxu0  ;;  %v447_v63 = vpop.f32.mrf.mxu1 }
 0x26d   :  { %v448_v1 = vadd.f32 %v901_v61, %v447_v63  ;;  %v334_v17 = vadd.f32 %v891_v15, %v333_v62  ;;  %v1178_v62 = vld [vmem:[#allocation2 + $0x190] sm:$0xff]   ;;  %v1179_v63 = vld [vmem:[#allocation2 + $0x188] sm:$0xff]  }
 0x26e   :  { %v1042_v4 = vpop.f32.mrf.mxu0  ;;  %v1062_v5 = vpop.f32.mrf.mxu1 }
 0x26f   :  { %v454_v6 = vmul.f32 0.5, %v448_v1  ;;  %v840_v25 = vmul.f32 %v334_v17, %v334_v17  ;;  %v1180_v1 = vld [vmem:[#allocation2 + $0x180] sm:$0xff]  }
 0x270   :  { %v336_v7 = vpop.f32.mrf.mxu0  ;;  %v450_v8 = vpop.f32.mrf.mxu1  ;;  %v921_v4 = vld [vmem:[%s1378_s3 + $0x5] ss:$0 sm:$0xff] }
 0x271   :  { %v456_v9 = vmul.f32 1.442695, %v454_v6  ;;  %v451_v10 = vadd.f32 %v901_v61, %v450_v8  ;;  %v337_v23 = vadd.f32 %v891_v15, %v336_v7 }
 0x272   :  { %v1043_v11 = vpop.f32.mrf.mxu0  ;;  %v1063_v12 = vpop.f32.mrf.mxu1 }
 0x273   :  { %1181 = vpow2.f32 %v456_v9  ;;  %v455_v13 = vmul.f32 0.5, %v451_v10  ;;  %v841_v31 = vmul.f32 %v337_v23, %v337_v23 }
 0x275   :  { %v458_v14 = vmul.f32 1.442695, %v455_v13 }
 0x277   :  { %1183 = vpow2.f32 %v458_v14 }
 0x280   :  { %v1182_v19 = vpop.eup %1181 }
 0x281   :  { %v940_v21 = vadd.f32 -1.0, %v1182_v19  ;;  %v463_v26 = vmul.f32 %v1182_v19, %v461_v20 }
 0x283   :  { %v838_v24 = vsub.f32 %v940_v21, %v454_v6  ;;  %v465_v33 = vadd.f32 %v463_v26, %v334_v17 }
 0x284   :  { %v1184_v27 = vpop.eup %1183 }
 0x285   :  { %v941_v28 = vadd.f32 -1.0, %v1184_v27  ;;  %v842_v29 = vadd.f32 %v840_v25, %v838_v24  ;;  %v464_v30 = vmul.f32 %v1184_v27, %v462_v22 }
 0x287   :  { %v839_v32 = vsub.f32 %v941_v28, %v455_v13  ;;  %844 = vadd.xlane.f32.xlu0 %v842_v29  ;;  %v466_v34 = vadd.f32 %v464_v30, %v337_v23  ;;  %v850_v28 = vlaneseq }
 0x289   :  { %v843_v35 = vadd.f32 %v841_v31, %v839_v32  ;;  %v484_v36 = vpack.c.bf16 %v466_v34, %v465_v33  ;;  %v851_v30 = vand.u32 127, %v850_v28 }
 0x28b   :  { %846 = vadd.xlane.f32.xlu0 %v843_v35  ;;  %1081 = vmatmul.mubr.bf16.vlgmr.msra.gmra.mxu0 %v484_v36  ;;  %vm853_vm11 = vcmp.eq.s32.totalorder %v851_v30, 1  ;;  %vm852_vm12 = vcmp.eq.s32.totalorder %v851_v30, 0 }
 0x28c   :  { %1120 = vmatprep.mubr.msk.bf16.mxu0 %vm1233_vm0, %v1232_v0  ;;  %1105 = vmatpush3.bf16.msra.mxu0 %v1173_v45 }
 0x28d   :  { %1106 = vmatprep.subr.bf16.mxu0 %v1232_v0 }
 0x290   :  { %1107 = vmatpush3.bf16.msra.mxu0 %v1174_v46 }
 0x291   :  { %1108 = vmatprep.subr.bf16.mxu0 %v1232_v0 }
 0x294   :  { %1109 = vmatpush3.bf16.msra.mxu0 %v1175_v47 }
 0x295   :  { %1110 = vmatprep.subr.bf16.mxu0 %v1232_v0 }
 0x298   :  { %1111 = vmatpush3.bf16.msra.mxu0 %v1176_v48 }
 0x299   :  { %1112 = vmatprep.subr.bf16.mxu0 %v1232_v0 }
 0x29c   :  { %1113 = vmatpush3.bf16.msra.mxu0 %v1177_v49 }
 0x29d   :  { %1114 = vmatprep.subr.bf16.mxu0 %v1232_v0 }
 0x2a0   :  { %1115 = vmatpush3.bf16.msra.mxu0 %v1178_v62 }
 0x2a1   :  { %1116 = vmatprep.subr.bf16.mxu0 %v1232_v0 }
 0x2a4   :  { %1117 = vmatpush3.bf16.msra.mxu0 %v1179_v63 }
 0x2a5   :  { %1118 = vmatprep.subr.bf16.mxu0 %v1232_v0  ;;  %v931_v0 = vld [vmem:[%s1378_s3 + $0x6] ss:$0 sm:$0xff]  ;;  %s1234_s3 = smov [#allocation5]  }
 0x2a6   :  { %s865_s15 = sshll.u32 %s1234_s3, 4  ;;  %s866_s15 = int_to_ptr.vmem [resolvable:$true] %s865_s15 }
 0x2a7   :  { %s1205_s16 = scalar_lea.vmem %s866_s15, 256  ;;  %p1210_p6 = scmp.lt.s32.totalorder %s866_s15, %s866_s15 }
 0x2a8   :  { %1119 = vmatpush3.bf16.msra.mxu0 %v1180_v1  ;;  %p1206_p5 = scmp.ne.s32.totalorder %s866_s15, %s1205_s16  ;;  %p1211_p7 = scmp.lt.s32.totalorder %s1205_s16, %s1205_s16 }
 0x2aa   :  { %p1212_p8 = por %p1211_p7, %p1210_p6 }
 0x2ac   :  { %p1213_p9 = pnand %p1212_p8, %p1206_p5 }
 0x310   :  { %v845_v29 = vpop.xlane.xlu0 %844 }
 0x311   :  { %v848_v31 = vmul.f32 0.5, %v845_v29 }
 0x313   :  { %v854_v34 = vsel %vm853_vm11, %v848_v31, 0.0 }
 0x314   :  { %v847_v32 = vpop.xlane.xlu0 %846 }
 0x315   :  { %v849_v35 = vmul.f32 0.5, %v847_v32 }
 0x317   :  { %v855_v38 = vsel %vm853_vm11, %v849_v35, 0.0 }
 0x34b   :  { %v575_v51 = vpop.f32.mrf.mxu0 }
 0x34c   :  { %v576_v52 = vadd.f32 %v911_v50, %v575_v51 }
 0x34d   :  { %v1082_v53 = vpop.f32.mrf.mxu0 }
 0x34e   :  { %v584_v55 = vmul.f32 0.01, %v576_v52  ;;  %vm582_vm7 = vcmp.gt.f32.partialorder %v576_v52, 0.0 }
 0x34f   :  { %v578_v54 = vpop.f32.mrf.mxu0 }
 0x350   :  { %v579_v56 = vadd.f32 %v911_v50, %v578_v54  ;;  %v586_v59 = vsel %vm582_vm7, %v576_v52, %v584_v55 }
 0x351   :  { %v1083_v57 = vpop.f32.mrf.mxu0 }
 0x352   :  { %vm583_vm8 = vcmp.gt.f32.partialorder %v579_v56, 0.0  ;;  %v585_v58 = vmul.f32 0.01, %v579_v56 }
 0x354   :  { %v587_v60 = vsel %vm583_vm8, %v579_v56, %v585_v58 }
 0x355   :  { %v605_v61 = vpack.c.bf16 %v587_v60, %v586_v59 }
 0x357   :  { %1101 = vmatmul.mubr.bf16.vlgmr.msra.gmra.mxu1 %v605_v61 }
 0x417   :  { %v696_v5 = vpop.f32.mrf.mxu1 }
 0x418   :  { %v697_v6 = vadd.f32 %v921_v4, %v696_v5 }
 0x419   :  { %v1102_v7 = vpop.f32.mrf.mxu1 }
 0x41a   :  { %v705_v9 = vmul.f32 0.01, %v697_v6  ;;  %vm703_vm9 = vcmp.gt.f32.partialorder %v697_v6, 0.0 }
 0x41b   :  { %v699_v8 = vpop.f32.mrf.mxu1 }
 0x41c   :  { %v700_v10 = vadd.f32 %v921_v4, %v699_v8  ;;  %v707_v13 = vsel %vm703_vm9, %v697_v6, %v705_v9 }
 0x41d   :  { %v1103_v11 = vpop.f32.mrf.mxu1 }
 0x41e   :  { %vm704_vm10 = vcmp.gt.f32.partialorder %v700_v10, 0.0  ;;  %v706_v12 = vmul.f32 0.01, %v700_v10 }
 0x420   :  { %v708_v14 = vsel %vm704_vm10, %v700_v10, %v706_v12 }
 0x421   :  { %v726_v15 = vpack.c.bf16 %v708_v14, %v707_v13 }
 0x423   :  { %1121 = vmatmul.mubr.bf16.vlgmr.msra.gmra.mxu0 %v726_v15 }
 0x4e3   :  { %v817_v16 = vpop.f32.mrf.mxu0 }
 0x4e4   :  { %v818_v17 = vadd.f32 %v931_v0, %v817_v16 }
 0x4e5   :  { %v1122_v18 = vpop.f32.mrf.mxu0 }
 0x4e6   :  { %v824_v19 = vsub.f32 %v818_v17, %v1274_v2 }
 0x4e7   :  { %v820_v20 = vpop.f32.mrf.mxu0 }
 0x4e8   :  { %v821_v21 = vadd.f32 %v931_v0, %v820_v20  ;;  %v826_v22 = vmul.f32 %v824_v19, %v824_v19 }
 0x4e9   :  { %v1123_v23 = vpop.f32.mrf.mxu0 }
 0x4ea   :  { %v825_v24 = vsub.f32 %v821_v21, %v1279_v3  ;;  %v828_v25 = vsel %vm53_vm1, %v826_v22, 0.0 }
 0x4eb   :  { %829 = vadd.xlane.f32.xlu1 %v828_v25 }
 0x4ec   :  { %v827_v26 = vmul.f32 %v825_v24, %v825_v24 }
 0x4ee   :  { %v831_v27 = vsel %vm53_vm1, %v827_v26, 0.0 }
 0x4ef   :  { %832 = vadd.xlane.f32.xlu1 %v831_v27 }
 0x574   :  { %v830_v2 = vpop.xlane.xlu1 %829 }
 0x575   :  { %v834_v33 = vmul.f32 0.0625, %v830_v2 }
 0x577   :  { %v856_v3 = vsel %vm852_vm12, %v834_v33, %v854_v34 }
 0x578   :  { %858 = vst [vmem:[#allocation5] sm:$0xff] %v856_v3  ;;  %v833_v36 = vpop.xlane.xlu1 %832 }
 0x579   :  { %v835_v37 = vmul.f32 0.0625, %v833_v36 }
 0x57b   :  { %v857_v39 = vsel %vm852_vm12, %v835_v37, %v855_v38 }
 0x57c   :  { %859 = vst [vmem:[#allocation5 + $0x8] sm:$0xff] %v857_v39 }
 0x57d   :  { %1216 = shalt.err (!%p1213_p9)
}
 0x57e   :  { %s1235_s17 = smov 128   ;;  %s1236_s18 = smov 8  }
 0x57f   :  { %871 = dma.vmem_to_hbm [thread:$0]  %s866_s15, 256, %s1379_s4, [#allocation4], %s1235_s17, %s1235_s17, %s1236_s18  }
 0x580   :  { %1227 = dma.done.wait [#allocation4], 256  }
 0x581   :  { %1228 = vsyncadd [#allocation4], 4294967040 }
 0x582   :  { %875 = vsyncpa [#allocation3], 1 }
 0x583   :  { %876 = vsyncpa [#allocation4], 1 }

</bundles_post_ra>
